<compile_context>
chip_gen: v5e
topology: v5e:2x2
jax: 0.10.0
libtpu: 0.0.40
codegen_flags: <defaults>
</compile_context>

<pallas_src>
import functools
from typing import NamedTuple

import jax
import jax.numpy as jnp
from jax.experimental import pallas as pl
from jax.experimental.pallas import tpu as pltpu


def _round_up(x, m):
    return (x + m - 1) // m * m


def _vmem_capacity_bytes():
    """Per-TensorCore VMEM capacity; conservative fallback if the query fails."""
    try:
        info = pltpu.get_tpu_info()
        cap = getattr(info, "vmem_capacity_bytes", None)
        if cap:
            return int(cap)
    except Exception:
        pass
    return 64 << 20  # v7x per-TC VMEM — safe lower bound on every generation


def _tile_bytes(tm, tn, two_h, itemsize):
    """Double-buffered working set for one grid step (conservative)."""
    return (2 * two_h * tn * itemsize     # fused weight tile, double-buffered
            + 2 * tm * two_h * itemsize   # [M|Q] activation tile, double-buffered
            + 2 * tn * 4                  # f32 bias tile, double-buffered
            + 2 * tm * tn * 4)            # f32 output tile, double-buffered


def _choose_vocab_tile(V, two_h, itemsize, vmem_budget, batch_blocks_hint=1):
    """Largest lane-dense vocab tile that fits VMEM with bounded zero-padding waste."""
    v128 = _round_up(V, 128)
    tn = 128
    for cand in (2048, 1024, 512, 256, 128):
        if cand > v128:
            continue  # tile bigger than the (padded) vocab would be pure zero padding
        pad = _round_up(v128, cand) - v128
        if pad > v128 // 4:
            continue  # cap zero-column streaming waste at 25%
        if _tile_bytes(256, cand, two_h, itemsize) <= vmem_budget:  # tm<=256 always
            tn = cand
            break
    # Keep >= 2 vocab blocks when the batch is a single block so a (1,1) grid never
    # idles one of v7x's two TensorCores (both axes are "parallel").
    if batch_blocks_hint <= 1:
        while tn > 128 and _round_up(v128, tn) // tn < 2:
            tn //= 2
    return tn


class AnswerParams(NamedTuple):
    w: jax.Array          # (2H, Vp) compute dtype — fused, pre-transposed weight
    bias: jax.Array       # (1, Vp) float32
    vocab_size: int       # original V (for the final slice)
    tn: int               # lane tile; Vp % tn == 0


def prepare_answer_params(weight, bias, *, batch_hint=128,
                          compute_dtype=jnp.bfloat16, vmem_budget=None):
    """One-time layout/dtype conversion of nn.Linear(2H, V) parameters.

    weight: (V, 2H) PyTorch layout; bias: (V,).
    Returns AnswerParams with a single fused (2H, Vp) weight (Vp padded to a multiple
    of the chosen lane tile) so the kernel computes  z = [M | Q] @ w + bias  in one
    MXU push per tile. Replaces any per-call weight.T — done once at init.
    """
    V, two_h = weight.shape
    itemsize = jnp.dtype(compute_dtype).itemsize
    if vmem_budget is None:
        vmem_budget = max(12 << 20, int(_vmem_capacity_bytes() * 0.70))
    batch_blocks_hint = -(-batch_hint // 256) if batch_hint > 256 else 1

    tn = _choose_vocab_tile(V, two_h, itemsize, vmem_budget, batch_blocks_hint)
    Vp = _round_up(_round_up(V, 128), tn)

    w = weight.T  # (2H, V): rows [0:H) multiply M, rows [H:2H) multiply questions
    if Vp != V:
        w = jnp.pad(w, ((0, 0), (0, Vp - V)))
        bias = jnp.pad(bias, (0, Vp - V))
    return AnswerParams(
        w=w.astype(compute_dtype),
        bias=bias.reshape(1, Vp).astype(jnp.float32),
        vocab_size=int(V),
        tn=int(tn),
    )


def _answer_kernel(x_ref, w_ref, b_ref, o_ref):
    # x_ref: (tm, 2H); w_ref: (2H, tn); b_ref: (1, tn) f32; o_ref: (tm, tn) f32.
    # Single K=2H MXU push with f32 accumulation, then lane-dense f32 bias add/store.
    o_ref[...] = (
        jnp.dot(x_ref[...], w_ref[...], preferred_element_type=jnp.float32)
        + b_ref[...]
    )


@functools.partial(jax.jit, static_argnames=("vocab_size", "tn"))
def _answer_forward_impl(M, questions, w, bias2d, *, vocab_size, tn):
    assert M.shape == questions.shape and M.shape[0] == 1
    _, B, H = M.shape
    two_h, Vp = w.shape
    assert two_h == 2 * H and bias2d.shape == (1, Vp) and Vp % tn == 0
    compute_dtype = w.dtype
    itemsize = jnp.dtype(compute_dtype).itemsize

    # Dropout(p=0.1) on M is eval-mode identity (inference path).
    # Fuse the concat in the wrapper: one (B, 2H) activation -> one matmul in-kernel.
    x = jnp.concatenate([M[0], questions[0]], axis=1).astype(compute_dtype)

    # Batch tile: single block up to 256 rows (fills the 256-wide MXU on v6e/v7x).
    tm = _round_up(B, 8) if B <= 256 else 256
    Bp = _round_up(B, tm)
    if Bp != B:
        x = jnp.pad(x, ((0, Bp - B), (0, 0)))

    # Batch is the inner grid axis -> the weight/bias column tiles keep the same block
    # index across all batch steps, so they are streamed from HBM exactly once.
    grid = (Vp // tn, Bp // tm)

    cap = _vmem_capacity_bytes()
    need = _tile_bytes(tm, tn, two_h, itemsize)
    vmem_limit = min(int(cap * 0.85), max(need + (4 << 20), 16 << 20))

    flops = 2 * Bp * two_h * Vp
    bytes_accessed = (two_h * Vp * itemsize     # fused weight, streamed once
                      + Bp * two_h * itemsize   # [M|Q] activations
                      + Vp * 4                  # bias
                      + Bp * Vp * 4)            # f32 output

    out = pl.pallas_call(
        _answer_kernel,
        out_shape=jax.ShapeDtypeStruct((Bp, Vp), jnp.float32),
        grid=grid,
        in_specs=[
            pl.BlockSpec((tm, two_h), lambda v, b: (b, 0)),  # [M|Q] rows
            pl.BlockSpec((two_h, tn), lambda v, b: (0, v)),  # fused weight columns
            pl.BlockSpec((1, tn), lambda v, b: (0, v)),      # bias columns
        ],
        out_specs=pl.BlockSpec((tm, tn), lambda v, b: (b, v)),
        compiler_params=pltpu.CompilerParams(
            dimension_semantics=("parallel", "parallel"),
            vmem_limit_bytes=vmem_limit,
        ),
        cost_estimate=pl.CostEstimate(
            flops=flops, transcendentals=0, bytes_accessed=bytes_accessed),
    )(x, w, bias2d)

    # Padded batch rows / vocab columns are sliced off here.
    return out[:B, :vocab_size]


def answer_module_forward(M, questions, params: AnswerParams):
    """M, questions: (1, B, H) float32 (seq-major, as in the PyTorch module).
    Returns (B, vocab_size) float32 logits."""
    return _answer_forward_impl(M, questions, params.w, params.bias,
                                vocab_size=params.vocab_size, tn=params.tn)


def _reference(M, questions, weight, bias):
    concat = jnp.concatenate([M, questions], axis=2)[0]  # (B, 2H)
    return concat @ weight.T + bias


if __name__ == "__main__":
    # Small deterministic shapes consistent with the module's forward.
    B = 8          # batch
    H = 32         # hidden_size
    V = 64         # vocab_size

    key = jax.random.PRNGKey(0)
    k_m, k_q, k_w, k_b = jax.random.split(key, 4)

    M = jax.random.normal(k_m, (1, B, H), dtype=jnp.float32)
    questions = jax.random.normal(k_q, (1, B, H), dtype=jnp.float32)

    # nn.Linear(2H, V): weight (V, 2H) xavier_normal, bias (V,) small values.
    xavier_std = (2.0 / (2 * H + V)) ** 0.5
    weight = jax.random.normal(k_w, (V, 2 * H), dtype=jnp.float32) * xavier_std
    bias = jax.random.uniform(k_b, (V,), dtype=jnp.float32, minval=-0.05, maxval=0.05)

    ref = _reference(M, questions, weight, bias)

    # f32 MXU path: tight check of kernel structure / glue.
    p32 = prepare_answer_params(weight, bias, batch_hint=B, compute_dtype=jnp.float32)
    out32 = jax.block_until_ready(answer_module_forward(M, questions, p32))
    assert out32.shape == (B, V)
    assert jnp.allclose(out32, ref, atol=1e-5, rtol=1e-5), "f32 mismatch vs reference"

    # bf16 MXU path (production dtype on v6e/v7x); f32 accumulation, looser tolerance
    # only from bf16 input/weight rounding.
    p16 = prepare_answer_params(weight, bias, batch_hint=B, compute_dtype=jnp.bfloat16)
    out16 = jax.block_until_ready(answer_module_forward(M, questions, p16))
    assert out16.shape == (B, V)
    assert jnp.allclose(out16, ref, atol=5e-2, rtol=5e-2), "bf16 mismatch vs reference"

    print("KERNEL_OK")
</pallas_src>

<mosaic_0001>
module attributes {stable_mosaic.version = 11 : i64} {
  func.func @_answer_kernel(%arg0: i32, %arg1: i32, %arg2: memref<8x64xf32, #tpu.memory_space<vmem>>, %arg3: memref<64x128xf32, #tpu.memory_space<vmem>>, %arg4: memref<1x128xf32, #tpu.memory_space<vmem>>, %arg5: memref<8x128xf32, #tpu.memory_space<vmem>>) attributes {dimension_semantics = [#tpu.dimension_semantics<parallel>, #tpu.dimension_semantics<parallel>], iteration_bounds = array<i64: 1, 1>, scalar_prefetch = 0 : i64, scratch_operands = 0 : i64, tpu.core_type = #tpu.core_type<tc>, window_params = [{transform_indices = @transform_0, window_bounds = array<i64: 8, 64>}, {transform_indices = @transform_1, window_bounds = array<i64: 64, 128>}, {transform_indices = @transform_2, window_bounds = array<i64: 1, 128>}, {transform_indices = @transform_3, window_bounds = array<i64: 8, 128>}]} {
    %c0 = arith.constant 0 : index
    %c0_0 = arith.constant 0 : index
    %0 = vector.load %arg2[%c0, %c0_0] : memref<8x64xf32, #tpu.memory_space<vmem>>, vector<8x64xf32>
    %c0_1 = arith.constant 0 : index
    %c0_2 = arith.constant 0 : index
    %1 = vector.load %arg3[%c0_1, %c0_2] : memref<64x128xf32, #tpu.memory_space<vmem>>, vector<64x128xf32>
    %cst = arith.constant dense<0.000000e+00> : vector<8x128xf32>
    %2 = tpu.matmul %0, %1, %cst {dimension_numbers = #tpu.dot_dimension_numbers<[1], [0], [0], [1], [0, 0, 1, 1], [], []>} : vector<8x64xf32>, vector<64x128xf32>, vector<8x128xf32> -> vector<8x128xf32>
    %c0_3 = arith.constant 0 : index
    %c0_4 = arith.constant 0 : index
    %3 = vector.load %arg4[%c0_3, %c0_4] : memref<1x128xf32, #tpu.memory_space<vmem>>, vector<1x128xf32>
    %4 = vector.broadcast %3 : vector<1x128xf32> to vector<8x128xf32>
    %5 = arith.addf %2, %4 : vector<8x128xf32>
    %c0_5 = arith.constant 0 : index
    %c0_6 = arith.constant 0 : index
    %6 = vector.load %arg5[%c0_5, %c0_6] : memref<8x128xf32, #tpu.memory_space<vmem>>, vector<8x128xf32>
    tpu.vector_store %arg5[%c0_5, %c0_6], %5 {strides = array<i32>} : memref<8x128xf32, #tpu.memory_space<vmem>>, vector<8x128xf32>,
    return
  }
  func.func @transform_0(%arg0: i32, %arg1: i32) -> (i32, i32) {
    %c0_i32 = arith.constant 0 : i32
    %c0_i32_0 = arith.constant 0 : i32
    return %arg1, %c0_i32 : i32, i32
  }
  func.func @transform_1(%arg0: i32, %arg1: i32) -> (i32, i32) {
    %c0_i32 = arith.constant 0 : i32
    %c0_i32_0 = arith.constant 0 : i32
    return %c0_i32, %arg0 : i32, i32
  }
  func.func @transform_2(%arg0: i32, %arg1: i32) -> (i32, i32) {
    %c0_i32 = arith.constant 0 : i32
    %c0_i32_0 = arith.constant 0 : i32
    return %c0_i32, %arg0 : i32, i32
  }
  func.func @transform_3(%arg0: i32, %arg1: i32) -> (i32, i32) {
    %c0_i32 = arith.constant 0 : i32
    return %arg1, %arg0 : i32, i32
  }
}

</mosaic_0001>

<bundles_post_ra>
// kernel: _answer_forward_impl.1
= control target key start
LH: loop header
LB: loop body
LE: loop exit
PB: predicated region body
PF: predicated region fallthrough
CT: control target
= control target key end

     0   :  { %8 = vsyncpa [#allocation3], 0  ;;  %s180_s0 = inlined_call_operand.vmem [shape: f32[8,64], index: 0, kind: input, shape index: {}]   ;;  %s181_s1 = inlined_call_operand.hbm [shape: f32[64,128], index: 1, kind: input, shape index: {}]   ;;  %s182_s2 = inlined_call_operand.vmem [shape: f32[1,128], index: 2, kind: input, shape index: {}]   ;;  %s183_s3 = inlined_call_operand.hbm [shape: f32[8,128], index: 3, kind: output, shape index: {}]  }
   0x1   :  { %9 = vsyncpa [#allocation4], 0  ;;  %s16_s14 = sshll.u32 %s181_s1, 4  ;;  %s144_s15 = smov [#allocation2]   ;;  %s17_s14 = int_to_ptr.hbm [resolvable:$true] %s16_s14 }
   0x2   :  { %s18_s16 = sshll.u32 %s144_s15, 4  ;;  %s145_s17 = smov 128   ;;  %s19_s16 = int_to_ptr.vmem [resolvable:$true] %s18_s16 }
   0x3   :  { %s146_s18 = smov 8  }
   0x4   :  { %24 = dma.hbm_to_vmem [thread:$0]  %s17_s14, 1024, %s19_s16, [#allocation3], %s145_s17, %s145_s17, %s146_s18  }
   0x5   :  { %140 = dma.done.wait [#allocation3], 1024  }
   0x6   :  { %141 = vsyncadd [#allocation3], 4294966272  ;;  %v39_v0 = vld [vmem:[#allocation2 + $0x38] sm:$0xff]  ;;  %v38_v1 = vld [vmem:[#allocation2 + $0x30] sm:$0xff]  ;;  %vm44_vm0 = vcmask 523264   ;;  %s147_s22 = smov [#allocation5]  }
   0x7   :  { %56 = vmatpush.msra.mxu0 %v39_v0  ;;  %v37_v2 = vld [vmem:[#allocation2 + $0x28] sm:$0xff]  ;;  %v36_v3 = vld [vmem:[#allocation2 + $0x20] sm:$0xff]  ;;  %v35_v4 = vld [vmem:[#allocation2 + $0x18] sm:$0xff]  ;;  %s74_s23 = sshll.u32 %s147_s22, 4  ;;  %s76_s26 = sshll.u32 %s183_s3, 4  ;;  %s75_s23 = int_to_ptr.vmem [resolvable:$true] %s74_s23  ;;  %s77_s26 = int_to_ptr.hbm [resolvable:$true] %s76_s26 }
   0x8   :  { %v34_v5 = vld [vmem:[#allocation2 + $0x10] sm:$0xff]  ;;  %v33_v6 = vld [vmem:[#allocation2 + $0x8] sm:$0xff]  ;;  %v32_v7 = vld [vmem:[#allocation2] sm:$0xff] }
   0x9   :  { %57 = vmatpush.msra.mxu0 %v38_v1  ;;  %v31_v8 = vld [vmem:[%s180_s0] sm:$0xff] }
   0xa   :  { %v91_v9 = vld [vmem:[%s182_s2] ss:$0 sm:$0xff] }
   0xb   :  { %58 = vmatpush.msra.mxu0 %v37_v2 }
   0xd   :  { %59 = vmatpush.msra.mxu0 %v36_v3 }
   0xf   :  { %60 = vmatpush.msra.mxu0 %v35_v4 }
  0x11   :  { %61 = vmatpush.msra.mxu0 %v34_v5 }
  0x13   :  { %62 = vmatpush.msra.mxu0 %v33_v6 }
  0x15   :  { %63 = vmatpush.msra.mxu0 %v32_v7 }
  0x16   :  { %86 = vmatmul.msk.f32.vlgmr.msra.gmra.mxu0 %vm44_vm0, %v31_v8 }
  0x93   :  { %v65_v10 = vpop.f32.mrf.mxu0 }
  0x94   :  { %v66_v11 = vadd.f32 %v91_v9, %v65_v10 }
  0x96   :  { %68 = vst [vmem:[#allocation5] sm:$0xff] %v66_v11 }
  0x97   :  { %79 = dma.vmem_to_hbm [thread:$0]  %s75_s23, 128, %s77_s26, [#allocation4]  }
  0x98   :  { %142 = dma.done.wait [#allocation4], 128  }
  0x99   :  { %143 = vsyncadd [#allocation4], 4294967168 }
  0x9a   :  { %84 = vsyncpa [#allocation3], 1 }
  0x9b   :  { %85 = vsyncpa [#allocation4], 1 }

</bundles_post_ra>
